<compile_context>
chip_gen: v7x
topology: tpu7x:2x2x1
jax: 0.10.0
libtpu: 0.0.40
codegen_flags: <defaults>
</compile_context>

<pallas_src>
import functools
import math

import jax
import jax.numpy as jnp
from jax import lax
from jax.experimental import pallas as pl
from jax.experimental.pallas import tpu as pltpu

block_size = 64      # upper bound on T (size of the module's tril buffer)
d_model = 32


# ----------------------------------------------------------------------------
# Kernel
# ----------------------------------------------------------------------------
def _multihead_kernel(x_ref, w_ref, b_ref, o_ref, *, n_heads, h_size, d_out,
                      batch, seq):
    """Causal MHA with the output projection pre-folded into the value path.

    x_ref : (batch, seq, E)          activations for this grid step
    w_ref : (H, E, 2*hs + d_out)     per-head [Wq_h | Wk_h | Wv_h @ Wp_h]
    b_ref : (1, d_out)               output-projection bias (f32)
    o_ref : (batch, seq, d_out)
    """
    H, hs, dm = n_heads, h_size, d_out
    E = x_ref.shape[-1]
    rows = batch * seq
    scale = hs ** (-0.5)
    mm_dtype = w_ref.dtype                      # bf16 fast path / f32 exact path

    # ---- fused Q/K/(V@Wp) projection, heads batched on the MXU batch dim ----
    # Only leading-dim reshape/broadcast (no lane/sublane relayout).
    x2 = x_ref[...].reshape(rows, E)                               # (rows, E)
    xh = jnp.broadcast_to(x2[None], (H, rows, E))                  # (H, rows, E)
    qkvp = jnp.einsum('hre,hec->hrc', xh, w_ref[...],
                      preferred_element_type=jnp.float32)          # (H, rows, C)
    # heads -> attention batch dim (row-major compatible leading-dim reshape)
    qkvp = qkvp.reshape(H * batch, seq, 2 * hs + dm)               # (HB, T, C)

    q = qkvp[:, :, :hs]                                            # (HB, T, hs)
    k = qkvp[:, :, hs:2 * hs]                                      # (HB, T, hs)
    vp = qkvp[:, :, 2 * hs:]                                       # (HB, T, dm)

    # ---- scores + causal mask + softmax (f32 elementwise, v5e-safe) ---------
    s = jnp.einsum('bqd,bkd->bqk', q.astype(mm_dtype), k.astype(mm_dtype),
                   preferred_element_type=jnp.float32) * scale     # (HB, T, T)
    row = lax.broadcasted_iota(jnp.int32, (seq, seq), 0)
    col = lax.broadcasted_iota(jnp.int32, (seq, seq), 1)
    # -inf is safe: the diagonal is always unmasked, so every softmax row has a
    # finite max.  (Do NOT reuse as-is for padded / fully-masked rows.)
    s = jnp.where(col <= row, s, -jnp.inf)

    m = jnp.max(s, axis=-1, keepdims=True)
    e = jnp.exp(s - m)
    denom = jnp.sum(e, axis=-1, keepdims=True)
    attn = e * pl.reciprocal(denom, approx=True)                   # EUP slot

    # ---- context; Wp already folded into vp -> just sum head contributions --
    ctx = jnp.einsum('bqk,bkd->bqd', attn.astype(mm_dtype), vp.astype(mm_dtype),
                     preferred_element_type=jnp.float32)           # (HB, T, dm)
    out = ctx[0:batch]
    for h in range(1, H):                       # H-1 vector adds (leading-dim
        out = out + ctx[h * batch:(h + 1) * batch]      # static slices, cheap)

    o_ref[...] = (out + b_ref[...]).astype(o_ref.dtype)


# ----------------------------------------------------------------------------
# One-time parameter repacking (hoisted out of the per-call path)
# ----------------------------------------------------------------------------
def pack_params(wq, wk, wv, wp, bias, *, mxu_bf16=True):
    """wq/wk/wv: (H, E, hs) stored (in, out); wp: (H*hs, d_out); bias: (d_out,).

    Returns (w_packed, bias2d) where
      w_packed : (H, E, 2*hs + d_out) = [Wq_h | Wk_h | Wv_h @ Wp_h]  per head
      bias2d   : (1, d_out) float32
    The output projection is folded algebraically into the value projection:
      attn @ ((x @ Wv_h) @ Wp_h) == attn @ (x @ (Wv_h @ Wp_h)).
    """
    H, E, hs = wq.shape
    d_out = wp.shape[-1]
    wvp = jnp.einsum('hek,hkd->hed', wv, wp.reshape(H, hs, d_out))  # (H, E, d)
    w_packed = jnp.concatenate([wq, wk, wvp], axis=-1)              # (H,E,2hs+d)
    if mxu_bf16:
        w_packed = w_packed.astype(jnp.bfloat16)
    return w_packed, bias.reshape(1, d_out).astype(jnp.float32)


# ----------------------------------------------------------------------------
# Per-call wrapper (jitted; only casts x and launches the kernel)
# ----------------------------------------------------------------------------
@functools.partial(jax.jit,
                   static_argnames=('n_heads', 'h_size', 'batch_blocks'))
def multihead_pallas(x, w_packed, bias2d, *, n_heads, h_size, batch_blocks=1):
    """x: (B, T, E).  batch_blocks=1 -> single grid step (v5e/v6e/v7x at these
    sizes); only use 2 (megacore split on v7x) when bb*T per step >= ~512 rows.
    """
    B, T, E = x.shape
    H, hs = n_heads, h_size
    dm = bias2d.shape[-1]
    C = 2 * hs + dm
    assert B % batch_blocks == 0
    bb = B // batch_blocks

    mm_dtype = w_packed.dtype
    x_in = x.astype(mm_dtype)                   # bf16 MXU inputs on fast path

    kernel = functools.partial(_multihead_kernel, n_heads=H, h_size=hs,
                               d_out=dm, batch=bb, seq=T)

    in_item = w_packed.dtype.itemsize
    flops = (2 * B * T * E * H * C              # fused QKV(+Wp-folded) projection
             + 2 * B * H * T * T * hs           # scores
             + 2 * B * H * T * T * dm)          # context (already in d_out space)
    bytes_accessed = (x_in.size * in_item + w_packed.size * in_item
                      + bias2d.size * 4 + B * T * dm * x.dtype.itemsize)
    cost = pl.CostEstimate(flops=flops, transcendentals=B * H * T * T,
                           bytes_accessed=bytes_accessed)

    out = pl.pallas_call(
        kernel,
        out_shape=jax.ShapeDtypeStruct((B, T, dm), x.dtype),
        grid_spec=pltpu.PrefetchScalarGridSpec(
            num_scalar_prefetch=0,
            grid=(batch_blocks,),
            in_specs=[
                pl.BlockSpec((bb, T, E), lambda i: (i, 0, 0)),
                pl.BlockSpec((H, E, C), lambda i: (0, 0, 0)),
                pl.BlockSpec((1, dm), lambda i: (0, 0)),
            ],
            out_specs=pl.BlockSpec((bb, T, dm), lambda i: (i, 0, 0)),
        ),
        compiler_params=pltpu.CompilerParams(
            dimension_semantics=("parallel",)),
        cost_estimate=cost,
    )(x_in, w_packed, bias2d)
    return out


# ----------------------------------------------------------------------------
# Pure-JAX reference mirroring the PyTorch forward
# ----------------------------------------------------------------------------
def multihead_ref(x, wq, wk, wv, wp, bias, *, n_heads, h_size):
    B, T, E = x.shape
    outs = []
    for h in range(n_heads):
        q = x @ wq[h]
        k = x @ wk[h]
        v = x @ wv[h]
        w = (q @ jnp.swapaxes(k, -2, -1)) * (h_size ** -0.5)
        tril = jnp.tril(jnp.ones((T, T)))
        w = jnp.where(tril == 0, -jnp.inf, w)
        w = jax.nn.softmax(w, axis=-1)
        outs.append(w @ v)
    y = jnp.concatenate(outs, axis=-1)
    return y @ wp + bias


if __name__ == "__main__":
    n_heads, h_size = 4, 8          # n_heads * h_size == d_model == 32
    B, T = 2, 8                     # T <= block_size

    key = jax.random.PRNGKey(0)
    kx, kq, kk, kv, kp, kb = jax.random.split(key, 6)

    x = jax.random.normal(kx, (B, T, d_model), dtype=jnp.float32)
    s = 1.0 / math.sqrt(d_model)
    wq = jax.random.uniform(kq, (n_heads, d_model, h_size), jnp.float32, -s, s)
    wk = jax.random.uniform(kk, (n_heads, d_model, h_size), jnp.float32, -s, s)
    wv = jax.random.uniform(kv, (n_heads, d_model, h_size), jnp.float32, -s, s)
    sp = 1.0 / math.sqrt(n_heads * h_size)
    wp = jax.random.uniform(kp, (n_heads * h_size, d_model), jnp.float32, -sp, sp)
    bias = jax.random.uniform(kb, (d_model,), jnp.float32, -sp, sp)

    ref = multihead_ref(x, wq, wk, wv, wp, bias, n_heads=n_heads, h_size=h_size)

    # --- exact-semantics path (f32 MXU operands) -----------------------------
    w32, b2d = pack_params(wq, wk, wv, wp, bias, mxu_bf16=False)
    out32 = jax.block_until_ready(
        multihead_pallas(x, w32, b2d, n_heads=n_heads, h_size=h_size,
                         batch_blocks=1))
    assert out32.shape == (B, T, d_model)
    # Wp-fold + approx reciprocal reorder some fp math -> tolerance relaxed
    # from 1e-5 (any structural bug would be orders of magnitude larger).
    assert jnp.allclose(out32, ref, atol=2e-3, rtol=2e-3), "f32 path mismatch"

    # --- fast path: bf16 MXU operands, f32 accumulation + f32 softmax --------
    w16, b2d16 = pack_params(wq, wk, wv, wp, bias, mxu_bf16=True)
    out16 = jax.block_until_ready(
        multihead_pallas(x, w16, b2d16, n_heads=n_heads, h_size=h_size,
                         batch_blocks=1))
    assert out16.shape == (B, T, d_model)
    assert jnp.allclose(out16, ref, atol=5e-2, rtol=5e-2), "bf16 path mismatch"

    print("KERNEL_OK")
</pallas_src>

<mosaic_0001>
module attributes {stable_mosaic.version = 11 : i64} {
  func.func @_multihead_kernel(%arg0: i32, %arg1: memref<2x8x32xf32, #tpu.memory_space<vmem>>, %arg2: memref<4x32x48xf32, #tpu.memory_space<vmem>>, %arg3: memref<1x32xf32, #tpu.memory_space<vmem>>, %arg4: memref<2x8x32xf32, #tpu.memory_space<vmem>>) attributes {dimension_semantics = [#tpu.dimension_semantics<parallel>], iteration_bounds = array<i64: 1>, scalar_prefetch = 0 : i64, scratch_operands = 0 : i64, tpu.core_type = #tpu.core_type<tc>, window_params = [{transform_indices = @transform_0, window_bounds = array<i64: 2, 8, 32>}, {pipeline_mode = #tpu.pipeline_mode<synchronous>, transform_indices = @transform_1, window_bounds = array<i64: 4, 32, 48>}, {pipeline_mode = #tpu.pipeline_mode<synchronous>, transform_indices = @transform_2, window_bounds = array<i64: 1, 32>}, {transform_indices = @transform_3, window_bounds = array<i64: 2, 8, 32>}]} {
    %c0 = arith.constant 0 : index
    %c0_0 = arith.constant 0 : index
    %c0_1 = arith.constant 0 : index
    %0 = vector.load %arg1[%c0, %c0_0, %c0_1] : memref<2x8x32xf32, #tpu.memory_space<vmem>>, vector<2x8x32xf32>
    %1 = vector.shape_cast %0 : vector<2x8x32xf32> to vector<16x32xf32>
    %2 = vector.shape_cast %1 : vector<16x32xf32> to vector<1x16x32xf32>
    %3 = vector.shape_cast %2 : vector<1x16x32xf32> to vector<1x16x32xf32>
    %4 = vector.broadcast %3 : vector<1x16x32xf32> to vector<4x16x32xf32>
    %c0_2 = arith.constant 0 : index
    %c0_3 = arith.constant 0 : index
    %c0_4 = arith.constant 0 : index
    %5 = vector.load %arg2[%c0_2, %c0_3, %c0_4] : memref<4x32x48xf32, #tpu.memory_space<vmem>>, vector<4x32x48xf32>
    "tpu.trace_start"() <{level = 10 : i32, message = "hre,hec->hrc"}> : () -> ()
    %cst = arith.constant dense<0.000000e+00> : vector<4x16x48xf32>
    %6 = tpu.matmul %4, %5, %cst {dimension_numbers = #tpu.dot_dimension_numbers<[2], [1], [1], [2], [0, 0, 0, 1, 1, 2], [0], [0]>} : vector<4x16x32xf32>, vector<4x32x48xf32>, vector<4x16x48xf32> -> vector<4x16x48xf32>
    "tpu.trace_stop"() : () -> ()
    %7 = vector.shape_cast %6 : vector<4x16x48xf32> to vector<8x8x48xf32>
    %8 = vector.extract_strided_slice %7 {offsets = [0, 0, 0], sizes = [8, 8, 8], strides = [1, 1, 1]} : vector<8x8x48xf32> to vector<8x8x8xf32>
    %9 = vector.extract_strided_slice %7 {offsets = [0, 0, 8], sizes = [8, 8, 8], strides = [1, 1, 1]} : vector<8x8x48xf32> to vector<8x8x8xf32>
    %10 = vector.extract_strided_slice %7 {offsets = [0, 0, 16], sizes = [8, 8, 32], strides = [1, 1, 1]} : vector<8x8x48xf32> to vector<8x8x32xf32>
    "tpu.trace_start"() <{level = 10 : i32, message = "bqd,bkd->bqk"}> : () -> ()
    %cst_5 = arith.constant dense<0.000000e+00> : vector<8x8x8xf32>
    %11 = tpu.matmul %8, %9, %cst_5 {dimension_numbers = #tpu.dot_dimension_numbers<[2], [2], [1], [1], [0, 0, 0, 1, 1, 1], [0], [0]>} : vector<8x8x8xf32>, vector<8x8x8xf32>, vector<8x8x8xf32> -> vector<8x8x8xf32>
    "tpu.trace_stop"() : () -> ()
    %cst_6 = arith.constant 0.353553385 : f32
    %12 = vector.broadcast %cst_6 : f32 to vector<8x8x8xf32>
    %13 = arith.mulf %11, %12 : vector<8x8x8xf32>
    %14 = tpu.iota {dimensions = array<i32: 0>} : vector<8x8xi32>
    %15 = tpu.iota {dimensions = array<i32: 1>} : vector<8x8xi32>
    %16 = arith.cmpi sle, %15, %14 : vector<8x8xi32>
    %cst_7 = arith.constant 0xFF800000 : f32
    %17 = vector.shape_cast %16 : vector<8x8xi1> to vector<1x8x8xi1>
    %18 = vector.broadcast %17 : vector<1x8x8xi1> to vector<8x8x8xi1>
    %19 = vector.broadcast %cst_7 : f32 to vector<8x8x8xf32>
    %20 = arith.select %18, %13, %19 : vector<8x8x8xi1>, vector<8x8x8xf32>
    %cst_8 = arith.constant dense<0xFF800000> : vector<8x8xf32>
    %21 = vector.multi_reduction <maximumf>, %20, %cst_8 [2] : vector<8x8x8xf32> to vector<8x8xf32>
    %22 = vector.shape_cast %21 : vector<8x8xf32> to vector<8x8x1xf32>
    %23 = vector.broadcast %22 : vector<8x8x1xf32> to vector<8x8x8xf32>
    %24 = arith.subf %20, %23 : vector<8x8x8xf32>
    %25 = math.exp %24 : vector<8x8x8xf32>
    %cst_9 = arith.constant dense<0.000000e+00> : vector<8x8xf32>
    %26 = vector.multi_reduction <add>, %25, %cst_9 [2] : vector<8x8x8xf32> to vector<8x8xf32>
    %27 = vector.shape_cast %26 : vector<8x8xf32> to vector<8x8x1xf32>
    %28 = tpu.reciprocal %27 {approx = true} : vector<8x8x1xf32> -> vector<8x8x1xf32>
    %29 = vector.broadcast %28 : vector<8x8x1xf32> to vector<8x8x8xf32>
    %30 = arith.mulf %25, %29 : vector<8x8x8xf32>
    "tpu.trace_start"() <{level = 10 : i32, message = "bqk,bkd->bqd"}> : () -> ()
    %cst_10 = arith.constant dense<0.000000e+00> : vector<8x8x32xf32>
    %31 = tpu.matmul %30, %10, %cst_10 {dimension_numbers = #tpu.dot_dimension_numbers<[2], [1], [1], [2], [0, 0, 0, 1, 1, 2], [0], [0]>} : vector<8x8x8xf32>, vector<8x8x32xf32>, vector<8x8x32xf32> -> vector<8x8x32xf32>
    "tpu.trace_stop"() : () -> ()
    %32 = vector.extract_strided_slice %31 {offsets = [0, 0, 0], sizes = [2, 8, 32], strides = [1, 1, 1]} : vector<8x8x32xf32> to vector<2x8x32xf32>
    %33 = vector.extract_strided_slice %31 {offsets = [2, 0, 0], sizes = [2, 8, 32], strides = [1, 1, 1]} : vector<8x8x32xf32> to vector<2x8x32xf32>
    %34 = arith.addf %32, %33 : vector<2x8x32xf32>
    %35 = vector.extract_strided_slice %31 {offsets = [4, 0, 0], sizes = [2, 8, 32], strides = [1, 1, 1]} : vector<8x8x32xf32> to vector<2x8x32xf32>
    %36 = arith.addf %34, %35 : vector<2x8x32xf32>
    %37 = vector.extract_strided_slice %31 {offsets = [6, 0, 0], sizes = [2, 8, 32], strides = [1, 1, 1]} : vector<8x8x32xf32> to vector<2x8x32xf32>
    %38 = arith.addf %36, %37 : vector<2x8x32xf32>
    %c0_11 = arith.constant 0 : index
    %c0_12 = arith.constant 0 : index
    %39 = vector.load %arg3[%c0_11, %c0_12] : memref<1x32xf32, #tpu.memory_space<vmem>>, vector<1x32xf32>
    %40 = vector.shape_cast %39 : vector<1x32xf32> to vector<1x1x32xf32>
    %41 = vector.broadcast %40 : vector<1x1x32xf32> to vector<2x8x32xf32>
    %42 = arith.addf %38, %41 : vector<2x8x32xf32>
    %c0_13 = arith.constant 0 : index
    %c0_14 = arith.constant 0 : index
    %c0_15 = arith.constant 0 : index
    %43 = vector.load %arg4[%c0_13, %c0_14, %c0_15] : memref<2x8x32xf32, #tpu.memory_space<vmem>>, vector<2x8x32xf32>
    tpu.vector_store %arg4[%c0_13, %c0_14, %c0_15], %42 {strides = array<i32>} : memref<2x8x32xf32, #tpu.memory_space<vmem>>, vector<2x8x32xf32>,
    return
  }
  func.func @transform_0(%arg0: i32) -> (i32, i32, i32) {
    %c0_i32 = arith.constant 0 : i32
    %c0_i32_0 = arith.constant 0 : i32
    %c0_i32_1 = arith.constant 0 : i32
    return %arg0, %c0_i32, %c0_i32_0 : i32, i32, i32
  }
  func.func @transform_1(%arg0: i32) -> (i32, i32, i32) {
    %c0_i32 = arith.constant 0 : i32
    %c0_i32_0 = arith.constant 0 : i32
    %c0_i32_1 = arith.constant 0 : i32
    %c0_i32_2 = arith.constant 0 : i32
    return %c0_i32, %c0_i32_0, %c0_i32_1 : i32, i32, i32
  }
  func.func @transform_2(%arg0: i32) -> (i32, i32) {
    %c0_i32 = arith.constant 0 : i32
    %c0_i32_0 = arith.constant 0 : i32
    %c0_i32_1 = arith.constant 0 : i32
    return %c0_i32, %c0_i32_0 : i32, i32
  }
  func.func @transform_3(%arg0: i32) -> (i32, i32, i32) {
    %c0_i32 = arith.constant 0 : i32
    %c0_i32_0 = arith.constant 0 : i32
    %c0_i32_1 = arith.constant 0 : i32
    return %arg0, %c0_i32, %c0_i32_0 : i32, i32, i32
  }
}

</mosaic_0001>

<bundles_post_ra>
// kernel: multihead_pallas.1
= control target key start
LH: loop header
LB: loop body
LE: loop exit
PB: predicated region body
PF: predicated region fallthrough
CT: control target
= control target key end

     0   :  { %8 = vsyncpa [#allocation3], 0  ;;  %s2344_s0 = inlined_call_operand.hbm [shape: f32[2,8,32], index: 0, kind: input, shape index: {}]   ;;  %s2345_s1 = inlined_call_operand.hbm [shape: f32[4,32,48], index: 1, kind: input, shape index: {}]   ;;  %s2346_s2 = inlined_call_operand.vmem [shape: f32[1,32], index: 2, kind: input, shape index: {}]   ;;  %s2347_s3 = inlined_call_operand.hbm [shape: f32[2,8,32], index: 3, kind: output, shape index: {}]  }
   0x1   :  { %9 = vsyncpa [#allocation6], 0 }
   0x2   :  { %10 = vsyncpa [#allocation4], 0  ;;  %s2097_s12 = smov [#allocation2]   ;;  %s2025_s16 = scalar_lea.hbm %s2344_s0, 256 }
   0x3   :  { %s16_s13 = sshll.u32 %s2097_s12, 4  ;;  %p2026_p0 = scmp.ne.s32.totalorder %s2344_s0, %s2025_s16  ;;  %s17_s13 = int_to_ptr.vmem [resolvable:$true] %s16_s13 }
   0x4   :  { %p2029_p1 = scmp.lt.u32.totalorder %s2025_s16, %s2344_s0 }
   0x6   :  { %p2031_p2 = pnand %p2029_p1, %p2026_p0 }
   0x8   :  { %2034 = shalt.err (!%p2031_p2)
}
   0x9   :  { %s2035_s21 = scalar_lea.vmem %s17_s13, 256  ;;  %p2040_p4 = scmp.lt.s32.totalorder %s17_s13, %s17_s13 }
   0xa   :  { %p2036_p3 = scmp.ne.s32.totalorder %s17_s13, %s2035_s21  ;;  %p2041_p5 = scmp.lt.s32.totalorder %s2035_s21, %s2035_s21 }
   0xc   :  { %p2042_p6 = por %p2041_p5, %p2040_p4 }
   0xe   :  { %p2043_p7 = pnand %p2042_p6, %p2036_p3 }
  0x10   :  { %2046 = shalt.err (!%p2043_p7)
}
  0x11   :  { %s2098_s22 = smov 128   ;;  %s2099_s23 = smov 8  }
  0x12   :  { %22 = dma.hbm_to_vmem [thread:$0]  %s2344_s0, 256, %s17_s13, [#allocation3], %s2098_s22, %s2098_s22, %s2099_s23  }
  0x13   :  { %s2100_s26 = smov [#allocation5]   ;;  %s2047_s30 = scalar_lea.hbm %s2345_s1, 2048 }
  0x14   :  { %s28_s27 = sshll.u32 %s2100_s26, 4  ;;  %p2048_p8 = scmp.ne.s32.totalorder %s2345_s1, %s2047_s30  ;;  %s29_s27 = int_to_ptr.vmem [resolvable:$true] %s28_s27 }
  0x15   :  { %p2051_p9 = scmp.lt.u32.totalorder %s2047_s30, %s2345_s1 }
  0x17   :  { %p2053_p10 = pnand %p2051_p9, %p2048_p8 }
  0x19   :  { %2056 = shalt.err (!%p2053_p10)
}
  0x1a   :  { %s2057_s8 = scalar_lea.vmem %s29_s27, 2048  ;;  %p2062_p12 = scmp.lt.s32.totalorder %s29_s27, %s29_s27 }
  0x1b   :  { %p2058_p11 = scmp.ne.s32.totalorder %s29_s27, %s2057_s8  ;;  %p2063_p13 = scmp.lt.s32.totalorder %s2057_s8, %s2057_s8 }
  0x1d   :  { %p2064_p0 = por %p2063_p13, %p2062_p12 }
  0x1f   :  { %p2065_p1 = pnand %p2064_p0, %p2058_p11 }
  0x21   :  { %2068 = shalt.err (!%p2065_p1)
}
  0x22   :  { %34 = dma.hbm_to_vmem [thread:$0]  %s2345_s1, 2048, %s29_s27, [#allocation6], %s2098_s22, %s2098_s22, %s2099_s23  }
  0x23   :  { %2091 = dma.done.wait [#allocation3], 256  }
  0x24   :  { %2092 = vsyncadd [#allocation3], 4294967040 }
  0x25   :  { %2093 = dma.done.wait [#allocation6], 2048  }
  0x26   :  { %2094 = vsyncadd [#allocation6], 4294965248  ;;  %v45_v0 = vld [vmem:[#allocation5] sm:$0xff]  ;;  %v46_v1 = vld [vmem:[#allocation5 + $0x8] sm:$0xff]  ;;  %vm61_vm0 = vcmask 261120   ;;  %v2101_v26 = vmov 0.0   ;;  %v993_v43 = vlaneseq }
  0x27   :  { %v49_v2 = vld [vmem:[#allocation5 + $0x20] sm:$0xff]  ;;  %v1952_v3 = vpack.c.bf16 %v46_v1, %v45_v0  ;;  %v50_v4 = vld [vmem:[#allocation5 + $0x28] sm:$0xff]  ;;  %v47_v5 = vld [vmem:[#allocation5 + $0x10] sm:$0xff]  ;;  %vm2102_vm1 = vmmov 0   ;;  %s2103_s1 = smov 120   ;;  %vm371_vm2 = vcmask 64512  }
  0x28   :  { %v48_v6 = vld [vmem:[#allocation5 + $0x18] sm:$0xff]  ;;  %v1960_v7 = vpack.c.bf16 %v50_v4, %v49_v2  ;;  %v51_v9 = vld [vmem:[#allocation5 + $0x30] sm:$0xff]  ;;  %v53_v13 = vld [vmem:[#allocation5 + $0x40] sm:$0xff]  ;;  %v994_v44 = vshrl.u32 %v993_v43, 7  ;;  %v996_v45 = vand.u32 127, %v993_v43  ;;  %s2104_s10 = smov 112  }
  0x29   :  { %v1956_v8 = vpack.c.bf16 %v48_v6, %v47_v5  ;;  %v52_v10 = vld [vmem:[#allocation5 + $0x38] sm:$0xff]  ;;  %v43_v11 = vld [vmem:[#allocation2] sm:$0xff]  ;;  %1953 = vmatprep.subr.bf16.mxu0 %v1952_v3  ;;  %v54_v14 = vld [vmem:[#allocation5 + $0x48] sm:$0xff]  ;;  %s2105_s13 = smov [#allocation7]  }
  0x2a   :  { %v1964_v12 = vpack.c.bf16 %v52_v10, %v51_v9  ;;  %1836 = vmatprep.mubr.msk.f32.mxu0 %vm61_vm0, %v43_v11  ;;  %1955 = vmatpush3.bf16.msra.mxu0 %v1952_v3  ;;  %v57_v15 = vld [vmem:[#allocation5 + $0x60] sm:$0xff]  ;;  %v1968_v16 = vpack.c.bf16 %v54_v14, %v53_v13  ;;  %v58_v17 = vld [vmem:[#allocation5 + $0x68] sm:$0xff]  ;;  %v55_v18 = vld [vmem:[#allocation5 + $0x50] sm:$0xff]  ;;  %vm2242_vm3 = vcmp.le.s32.totalorder %v996_v45, %v994_v44  ;;  %s1726_s14 = sshll.u32 %s2105_s13, 4  ;;  %s1727_s14 = int_to_ptr.vmem [resolvable:$true] %s1726_s14 }
  0x2b   :  { %1961 = vmatprep.subr.bf16.mxu1 %v1960_v7  ;;  %1957 = vmatprep.subr.bf16.mxu0 %v1956_v8  ;;  %v56_v19 = vld [vmem:[#allocation5 + $0x58] sm:$0xff]  ;;  %v1976_v20 = vpack.c.bf16 %v58_v17, %v57_v15  ;;  %v59_v21 = vld [vmem:[#allocation5 + $0x70] sm:$0xff]  ;;  %s2069_s15 = scalar_lea.vmem %s1727_s14, 256  ;;  %p2074_p3 = scmp.lt.s32.totalorder %s1727_s14, %s1727_s14 }
  0x2c   :  { %1963 = vmatpush3.bf16.msra.mxu1 %v1960_v7  ;;  %1847 = vmatprep.mubr.msk.f32.mxu1 %vm61_vm0, %v43_v11  ;;  %v60_v22 = vld [vmem:[#allocation5 + $0x78] sm:$0xff]  ;;  %v1972_v24 = vpack.c.bf16 %v56_v19, %v55_v18  ;;  %p2070_p2 = scmp.ne.s32.totalorder %s1727_s14, %s2069_s15  ;;  %p2075_p4 = scmp.lt.s32.totalorder %s2069_s15, %s2069_s15 }
  0x2d   :  { %1965 = vmatprep.subr.bf16.mxu1 %v1964_v12  ;;  %v44_v23 = vld [vmem:[#allocation2 + $0x8] sm:$0xff]  ;;  %v1980_v25 = vpack.c.bf16 %v60_v22, %v59_v21 }
  0x2e   :  { %1959 = vmatpush3.bf16.msra.mxu0 %v1956_v8  ;;  %p2076_p5 = por %p2075_p4, %p2074_p3 }
  0x2f   :  { %1969 = vmatprep.subr.bf16.mxu0 %v1968_v16 }
  0x30   :  { %1967 = vmatpush3.bf16.msra.mxu1 %v1964_v12  ;;  %p2077_p6 = pnand %p2076_p5, %p2070_p2 }
  0x31   :  { %1977 = vmatprep.subr.bf16.mxu1 %v1976_v20  ;;  %1837 = vmatmul.mubr.msk.f32.vlgmr.msra.gmra.mrb[0].mxu0 %vm61_vm0, %v44_v23 }
  0x32   :  { %1971 = vmatpush3.bf16.msra.mxu0 %v1968_v16  ;;  %1858 = vmatprep.mubr.msk.f32.mxu0 %vm61_vm0, %v43_v11 }
  0x33   :  { %1848 = vmatmul.mubr.msk.f32.vlgmr.msra.gmra.mrb[0].mxu1 %vm61_vm0, %v44_v23  ;;  %1973 = vmatprep.subr.bf16.mxu0 %v1972_v24 }
  0x34   :  { %1979 = vmatpush3.bf16.msra.mxu1 %v1976_v20  ;;  %1869 = vmatprep.mubr.msk.f32.mxu1 %vm61_vm0, %v43_v11 }
  0x35   :  { %1981 = vmatprep.subr.bf16.mxu1 %v1980_v25 }
  0x36   :  { %1975 = vmatpush3.bf16.msra.mxu0 %v1972_v24 }
  0x37   :  { %1872 = vmatprep.subr.mxu0 %v2101_v26 }
  0x38   :  { %1983 = vmatpush3.bf16.msra.mxu1 %v1980_v25 }
  0x39   :  { %1859 = vmatmul.mubr.msk.f32.vlgmr.msra.gmra.mrb[2].mxu0 %vm61_vm0, %v44_v23  ;;  %1877 = vmatprep.subr.mxu1 %v2101_v26 }
  0x3a   :  { %1874 = vmatprep.mubr.msk.f32.mxu0 %vm2102_vm1, %v2101_v26 }
  0x3b   :  { %1870 = vmatmul.mubr.msk.f32.vlgmr.msra.gmra.mrb[2].mxu1 %vm61_vm0, %v44_v23 }
  0x3c   :  { %1879 = vmatprep.mubr.msk.f32.mxu1 %vm2102_vm1, %v2101_v26 }
 0x104   :  { %v2170_v27 = vpop.f32.mrb[0].mxu0 }
 0x105   :  { %v2172_v28 = vpop.f32.mrb[1].mxu0 }
 0x106   :  { %v2174_v29 = vpop.f32.mrb[0].mxu1  ;;  %369 = vrot.lane.b32.xlu0 %v2172_v28, %s2103_s1 }
 0x107   :  { %601 = vrot.lane.b32.xlu1 %v2174_v29, %s2103_s1  ;;  %v2178_v30 = vpop.f32.mrb[1].mxu1 }
 0x10a   :  { %447 = vrot.lane.b32.xlu0 %v2170_v27, %s2103_s1 }
 0x10b   :  { %524 = vrot.lane.b32.xlu1 %v2178_v30, %s2103_s1 }
 0x10c   :  { %v2182_v31 = vpop.f32.mrb[2].mxu0 }
 0x10d   :  { %v2184_v32 = vpop.f32.mrb[3].mxu0 }
 0x10e   :  { %v2186_v33 = vpop.f32.mrb[2].mxu1  ;;  %678 = vrot.lane.b32.xlu0 %v2184_v32, %s2103_s1 }
 0x10f   :  { %v2189_v34 = vpop.f32.mrb[3].mxu1  ;;  %755 = vrot.lane.b32.xlu1 %v2182_v31, %s2103_s1 }
 0x112   :  { %832 = vrot.lane.b32.xlu0 %v2189_v34, %s2103_s1 }
 0x113   :  { %909 = vrot.lane.b32.xlu1 %v2186_v33, %s2103_s1 }
 0x178   :  { %v370_v36 = vpop.permute.xlu0 %369 }
 0x179   :  { %v602_v35 = vpop.permute.xlu1 %601  ;;  %1873 = vmatpush3.xpose.msk.msra.mxu0 %vm371_vm2, %v370_v36 }
 0x17a   :  { %1882 = vmatprep.subr.mxu0 %v2101_v26 }
 0x17c   :  { %1875 = vmatmul.mubr.msk.f32.vlgmr.msra.gmra.mrb[4].mxu0 %vm371_vm2, %v2172_v28  ;;  %v448_v38 = vpop.permute.xlu0 %447 }
 0x17d   :  { %v525_v37 = vpop.permute.xlu1 %524  ;;  %1878 = vmatpush3.xpose.msk.msra.mxu1 %vm371_vm2, %v448_v38  ;;  %1884 = vmatprep.mubr.msk.f32.mxu0 %vm2102_vm1, %v2101_v26 }
 0x17e   :  { %1883 = vmatpush3.xpose.msk.msra.mxu0 %vm371_vm2, %v525_v37  ;;  %1887 = vmatprep.subr.mxu1 %v2101_v26 }
 0x17f   :  { %1892 = vmatprep.subr.mxu0 %v2101_v26 }
 0x180   :  { %1880 = vmatmul.mubr.msk.f32.vlgmr.msra.gmra.mrb[4].mxu1 %vm371_vm2, %v2170_v27  ;;  %v679_v39 = vpop.permute.xlu0 %678 }
 0x181   :  { %1885 = vmatmul.mubr.msk.f32.vlgmr.msra.gmra.mrb[6].mxu0 %vm371_vm2, %v2178_v30  ;;  %v756_v40 = vpop.permute.xlu1 %755  ;;  %1888 = vmatpush3.xpose.msk.msra.mxu1 %vm371_vm2, %v602_v35 }
 0x182   :  { %1893 = vmatpush3.xpose.msk.msra.mxu0 %vm371_vm2, %v679_v39  ;;  %1889 = vmatprep.mubr.msk.f32.mxu1 %vm2102_vm1, %v2101_v26 }
 0x183   :  { %1894 = vmatprep.mubr.msk.f32.mxu0 %vm2102_vm1, %v2101_v26  ;;  %1897 = vmatprep.subr.mxu1 %v2101_v26 }
 0x184   :  { %1902 = vmatprep.subr.mxu0 %v2101_v26  ;;  %1890 = vmatmul.mubr.msk.f32.vlgmr.msra.gmra.mrb[6].mxu1 %vm371_vm2, %v2174_v29  ;;  %v833_v41 = vpop.permute.xlu0 %832 }
 0x185   :  { %1895 = vmatmul.mubr.msk.f32.vlgmr.msra.gmra.mrb[8].mxu0 %vm371_vm2, %v2184_v32  ;;  %1898 = vmatpush3.xpose.msk.msra.mxu1 %vm371_vm2, %v756_v40  ;;  %v910_v42 = vpop.permute.xlu1 %909 }
 0x186   :  { %1903 = vmatpush3.xpose.msk.msra.mxu0 %vm371_vm2, %v833_v41  ;;  %1899 = vmatprep.mubr.msk.f32.mxu1 %vm2102_vm1, %v2101_v26 }
 0x187   :  { %1904 = vmatprep.mubr.msk.f32.mxu0 %vm2102_vm1, %v2101_v26  ;;  %1907 = vmatprep.subr.mxu1 %v2101_v26 }
 0x188   :  { %1912 = vmatprep.subr.mxu0 %v2101_v26  ;;  %1900 = vmatmul.mubr.msk.f32.vlgmr.msra.gmra.mrb[8].mxu1 %vm371_vm2, %v2182_v31 }
 0x189   :  { %1905 = vmatmul.mubr.msk.f32.vlgmr.msra.gmra.mrb[10].mxu0 %vm371_vm2, %v2189_v34  ;;  %1908 = vmatpush3.xpose.msk.msra.mxu1 %vm371_vm2, %v910_v42 }
 0x18a   :  { %1909 = vmatprep.mubr.msk.f32.mxu1 %vm2102_vm1, %v2101_v26  ;;  %1917 = vmatprep.subr.mxu1 %v2101_v26 }
 0x18b   :  { %1914 = vmatprep.mubr.msk.f32.mxu0 %vm2102_vm1, %v2101_v26 }
 0x18c   :  { %1910 = vmatmul.mubr.msk.f32.vlgmr.msra.gmra.mrb[10].mxu1 %vm371_vm2, %v2186_v33 }
 0x18d   :  { %1919 = vmatprep.mubr.msk.f32.mxu1 %vm2102_vm1, %v2101_v26 }
 0x24f   :  { %v442_v46 = vpop.f32.mrb[4].mxu0 }
 0x250   :  { %v985_v48 = vmul.f32 0.35355338, %v442_v46  ;;  %v1876_v49 = vpop.f32.mrb[5].mxu0 }
 0x252   :  { %v1000_v50 = vsel %vm2242_vm3, %v985_v48, -inf }
 0x253   :  { %v519_v51 = vpop.f32.mrb[4].mxu1  ;;  %v1008_v53 = vsel %vm371_vm2, %v1000_v50, -inf }
 0x254   :  { %v596_v52 = vpop.f32.mrb[6].mxu0  ;;  %v986_v54 = vmul.f32 0.35355338, %v519_v51  ;;  %v1881_v55 = vpop.f32.mrb[5].mxu1  ;;  %1009 = vmax.xlane.f32.xlu0 %v1008_v53 }
 0x255   :  { %v1886_v56 = vpop.f32.mrb[7].mxu0  ;;  %v987_v58 = vmul.f32 0.35355338, %v596_v52 }
 0x256   :  { %v1001_v57 = vsel %vm2242_vm3, %v986_v54, -inf }
 0x257   :  { %v673_v59 = vpop.f32.mrb[6].mxu1  ;;  %v1011_v61 = vsel %vm371_vm2, %v1001_v57, -inf  ;;  %v1002_v8 = vsel %vm2242_vm3, %v987_v58, -inf }
 0x258   :  { %v750_v60 = vpop.f32.mrb[8].mxu0  ;;  %v988_v62 = vmul.f32 0.35355338, %v673_v59  ;;  %v1891_v0 = vpop.f32.mrb[7].mxu1  ;;  %1012 = vmax.xlane.f32.xlu1 %v1011_v61  ;;  %v1014_v15 = vsel %vm371_vm2, %v1002_v8, -inf }
 0x259   :  { %v989_v63 = vmul.f32 0.35355338, %v750_v60  ;;  %v1896_v1 = vpop.f32.mrb[9].mxu0 }
 0x25a   :  { %v1003_v2 = vsel %vm2242_vm3, %v988_v62, -inf }
 0x25b   :  { %v1004_v3 = vsel %vm2242_vm3, %v989_v63, -inf  ;;  %v827_v4 = vpop.f32.mrb[8].mxu1  ;;  %v1017_v6 = vsel %vm371_vm2, %v1003_v2, -inf }
 0x25c   :  { %v904_v5 = vpop.f32.mrb[10].mxu0  ;;  %v1020_v7 = vsel %vm371_vm2, %v1004_v3, -inf  ;;  %v990_v9 = vmul.f32 0.35355338, %v827_v4  ;;  %v1901_v11 = vpop.f32.mrb[9].mxu1  ;;  %1018 = vmax.xlane.f32.xlu0 %v1017_v6 }
 0x25d   :  { %v991_v10 = vmul.f32 0.35355338, %v904_v5  ;;  %1021 = vmax.xlane.f32.xlu1 %v1020_v7  ;;  %v1906_v12 = vpop.f32.mrb[11].mxu0 }
 0x25e   :  { %v1005_v19 = vsel %vm2242_vm3, %v990_v9, -inf }
 0x25f   :  { %v1006_v13 = vsel %vm2242_vm3, %v991_v10, -inf  ;;  %v981_v14 = vpop.f32.mrb[10].mxu1  ;;  %v1023_v20 = vsel %vm371_vm2, %v1005_v19, -inf }
 0x260   :  { %v1026_v16 = vsel %vm371_vm2, %v1006_v13, -inf  ;;  %v992_v17 = vmul.f32 0.35355338, %v981_v14  ;;  %v1911_v18 = vpop.f32.mrb[11].mxu1  ;;  %1015 = vmax.xlane.f32.xlu0 %v1014_v15 }
 0x261   :  { %1027 = vmax.xlane.f32.xlu1 %v1026_v16 }
 0x262   :  { %v1007_v21 = vsel %vm2242_vm3, %v992_v17, -inf }
 0x263   :  { %v1029_v22 = vsel %vm371_vm2, %v1007_v21, -inf }
 0x264   :  { %1024 = vmax.xlane.f32.xlu0 %v1023_v20 }
 0x268   :  { %1030 = vmax.xlane.f32.xlu0 %v1029_v22 }
 0x272   :  { %1096 = vrot.lane.b32.xlu1 %v2172_v28, %s2104_s10 }
 0x276   :  { %1248 = vrot.lane.b32.xlu1 %v2178_v30, %s2104_s10 }
 0x27a   :  { %1324 = vrot.lane.b32.xlu1 %v2174_v29, %s2104_s10 }
 0x27e   :  { %1476 = vrot.lane.b32.xlu1 %v2182_v31, %s2104_s10  ;;  %1172 = vrot.lane.b32.xlu0 %v2170_v27, %s2104_s10 }
 0x282   :  { %1400 = vrot.lane.b32.xlu0 %v2184_v32, %s2104_s10 }
 0x2e1   :  { %v1010_v23 = vpop.xlane.xlu0 %1009 }
 0x2e2   :  { %v1032_v24 = vsub.f32 %v1000_v50, %v1010_v23 }
 0x2e4   :  { %v1040_v25 = vmul.f32 1.442695, %v1032_v24 }
 0x2e5   :  { %v1013_v35 = vpop.xlane.xlu1 %1012 }
 0x2e6   :  { %1993 = vpow2.f32 %v1040_v25  ;;  %v1033_v28 = vsub.f32 %v1001_v57, %v1013_v35 }
 0x2e8   :  { %v1042_v36 = vmul.f32 1.442695, %v1033_v28 }
 0x2e9   :  { %v1019_v30 = vpop.xlane.xlu0 %1018 }
 0x2ea   :  { %v1022_v37 = vpop.xlane.xlu1 %1021  ;;  %1995 = vpow2.f32 %v1042_v36  ;;  %v1035_v29 = vsub.f32 %v1003_v2, %v1019_v30 }
 0x2eb   :  { %v1036_v39 = vsub.f32 %v1004_v3, %v1022_v37 }
 0x2ec   :  { %v1046_v38 = vmul.f32 1.442695, %v1035_v29 }
 0x2ed   :  { %v1016_v31 = vpop.xlane.xlu0 %1015  ;;  %v1048_v42 = vmul.f32 1.442695, %v1036_v39 }
 0x2ee   :  { %v1028_v40 = vpop.xlane.xlu1 %1027  ;;  %1997 = vpow2.f32 %v1046_v38  ;;  %v1034_v27 = vsub.f32 %v1002_v8, %v1016_v31 }
 0x2ef   :  { %v1038_v43 = vsub.f32 %v1006_v13, %v1028_v40 }
 0x2f0   :  { %v1994_v41 = vpop.eup %1993  ;;  %v1044_v32 = vmul.f32 1.442695, %v1034_v27 }
 0x2f1   :  { %v1025_v44 = vpop.xlane.xlu0 %1024  ;;  %v1056_v46 = vsel %vm371_vm2, %v1994_v41, 0.0  ;;  %v1052_v49 = vmul.f32 1.442695, %v1038_v43 }
 0x2f2   :  { %v1097_v45 = vpop.permute.xlu1 %1096  ;;  %1999 = vpow2.f32 %v1044_v32  ;;  %v1037_v47 = vsub.f32 %v1005_v19, %v1025_v44  ;;  %1057 = vadd.xlane.f32.xlu1 %v1056_v46 }
 0x2f3   :  { %1913 = vmatpush3.msra.mxu0 %v1097_v45  ;;  %2001 = vpow2.f32 %v1048_v42 }
 0x2f4   :  { %1922 = vmatprep.subr.mxu0 %v2101_v26  ;;  %v1996_v48 = vpop.eup %1995  ;;  %v1050_v50 = vmul.f32 1.442695, %v1037_v47 }
 0x2f5   :  { %v1031_v51 = vpop.xlane.xlu0 %1030  ;;  %v1059_v52 = vsel %vm371_vm2, %v1996_v48, 0.0 }
 0x2f6   :  { %2003 = vpow2.f32 %v1050_v50  ;;  %v1039_v53 = vsub.f32 %v1007_v21, %v1031_v51  ;;  %1060 = vadd.xlane.f32.xlu0 %v1059_v52  ;;  %v1249_v4 = vpop.permute.xlu1 %1248  ;;  %v1771_v50 = vld [vmem:[%s2346_s2] ss:$0 sm:$0xff] }
 0x2f7   :  { %2005 = vpow2.f32 %v1052_v49 }
 0x2f8   :  { %v1998_v54 = vpop.eup %1997  ;;  %v1054_v55 = vmul.f32 1.442695, %v1039_v53 }
 0x2f9   :  { %v1173_v56 = vpop.permute.xlu0 %1172  ;;  %v1065_v57 = vsel %vm371_vm2, %v1998_v54, 0.0 }
 0x2fa   :  { %2007 = vpow2.f32 %v1054_v55  ;;  %1066 = vadd.xlane.f32.xlu0 %v1065_v57  ;;  %1918 = vmatpush3.msra.mxu1 %v1173_v56  ;;  %v1325_v5 = vpop.permute.xlu1 %1324 }
 0x2fb   :  { %1927 = vmatprep.subr.mxu1 %v2101_v26 }
 0x2fc   :  { %v2000_v58 = vpop.eup %1999 }
 0x2fd   :  { %v1062_v59 = vsel %vm371_vm2, %v2000_v58, 0.0  ;;  %v2002_v60 = vpop.eup %2001  ;;  %v1401_v7 = vpop.permute.xlu0 %1400 }
 0x2fe   :  { %1063 = vadd.xlane.f32.xlu1 %v1062_v59  ;;  %v1068_v63 = vsel %vm371_vm2, %v2002_v60, 0.0  ;;  %v1477_v6 = vpop.permute.xlu1 %1476 }
 0x300   :  { %v2004_v61 = vpop.eup %2003 }
 0x301   :  { %v1071_v62 = vsel %vm371_vm2, %v2004_v61, 0.0  ;;  %v2290_v0 = vpop.eup %2005 }
 0x302   :  { %1072 = vadd.xlane.f32.xlu0 %v1071_v62  ;;  %1069 = vadd.xlane.f32.xlu1 %v1068_v63  ;;  %v1074_v3 = vsel %vm371_vm2, %v2290_v0, 0.0 }
 0x304   :  { %v2008_v1 = vpop.eup %2007 }
 0x305   :  { %v1077_v2 = vsel %vm371_vm2, %v2008_v1, 0.0 }
 0x306   :  { %1078 = vadd.xlane.f32.xlu0 %v1077_v2  ;;  %1075 = vadd.xlane.f32.xlu1 %v1074_v3 }
 0x317   :  { %1628 = vrot.lane.b32.xlu1 %v2186_v33, %s2104_s10 }
 0x31c   :  { %1552 = vrot.lane.b32.xlu0 %v2189_v34, %s2104_s10 }
 0x37f   :  { %v1058_v8 = vpop.xlane.xlu1 %1057 }
 0x380   :  { %2009 = vrcp.f32 %v1058_v8 }
 0x383   :  { %v1061_v9 = vpop.xlane.xlu0 %1060 }
 0x384   :  { %2011 = vrcp.f32 %v1061_v9 }
 0x387   :  { %v1067_v10 = vpop.xlane.xlu0 %1066 }
 0x388   :  { %2013 = vrcp.f32 %v1067_v10 }
 0x38a   :  { %v2010_v11 = vpop.eup %2009 }
 0x38b   :  { %v1088_v12 = vmul.f32 %v2010_v11, %v1994_v41  ;;  %v1064_v13 = vpop.xlane.xlu1 %1063 }
 0x38c   :  { %2015 = vrcp.f32 %v1064_v13 }
 0x38d   :  { %1915 = vmatmul.mubr.msk.f32.vlgmr.msra.gmra.mrb[12].mxu0 %vm371_vm2, %v1088_v12 }
 0x38e   :  { %v2012_v33 = vpop.eup %2011  ;;  %1923 = vmatpush3.msra.mxu0 %v1249_v4  ;;  %1924 = vmatprep.mubr.msk.f32.mxu0 %vm2102_vm1, %v2101_v26 }
 0x38f   :  { %v1089_v34 = vmul.f32 %v2012_v33, %v1996_v48  ;;  %v1073_v14 = vpop.xlane.xlu0 %1072  ;;  %v1070_v15 = vpop.xlane.xlu1 %1069  ;;  %1932 = vmatprep.subr.mxu0 %v2101_v26 }
 0x390   :  { %2017 = vrcp.f32 %v1073_v14 }
 0x391   :  { %2019 = vrcp.f32 %v1070_v15  ;;  %1920 = vmatmul.mubr.msk.f32.vlgmr.msra.gmra.mrb[12].mxu1 %vm371_vm2, %v1089_v34 }
 0x392   :  { %v2014_v16 = vpop.eup %2013  ;;  %1928 = vmatpush3.msra.mxu1 %v1325_v5  ;;  %1929 = vmatprep.mubr.msk.f32.mxu1 %vm2102_vm1, %v2101_v26 }
 0x393   :  { %v1091_v17 = vmul.f32 %v2014_v16, %v1998_v54  ;;  %v1079_v18 = vpop.xlane.xlu0 %1078  ;;  %v1076_v19 = vpop.xlane.xlu1 %1075  ;;  %1937 = vmatprep.subr.mxu1 %v2101_v26 }
 0x394   :  { %2021 = vrcp.f32 %v1079_v18 }
 0x395   :  { %2023 = vrcp.f32 %v1076_v19  ;;  %1930 = vmatmul.mubr.msk.f32.vlgmr.msra.gmra.mrb[14].mxu1 %vm371_vm2, %v1091_v17 }
 0x396   :  { %v2016_v20 = vpop.eup %2015  ;;  %1938 = vmatpush3.msra.mxu1 %v1477_v6  ;;  %1939 = vmatprep.mubr.msk.f32.mxu1 %vm2102_vm1, %v2101_v26 }
 0x397   :  { %v1090_v21 = vmul.f32 %v2016_v20, %v2000_v58  ;;  %1947 = vmatprep.subr.mxu1 %v2101_v26  ;;  %v1629_v35 = vpop.permute.xlu1 %1628  ;;  %v1553_v36 = vpop.permute.xlu0 %1552 }
 0x399   :  { %1925 = vmatmul.mubr.msk.f32.vlgmr.msra.gmra.mrb[14].mxu0 %vm371_vm2, %v1090_v21 }
 0x39a   :  { %v2018_v22 = vpop.eup %2017  ;;  %1933 = vmatpush3.msra.mxu0 %v1401_v7  ;;  %1934 = vmatprep.mubr.msk.f32.mxu0 %vm2102_vm1, %v2101_v26 }
 0x39b   :  { %v2020_v23 = vpop.eup %2019  ;;  %v1093_v24 = vmul.f32 %v2018_v22, %v2004_v61  ;;  %1942 = vmatprep.subr.mxu0 %v2101_v26 }
 0x39c   :  { %v1092_v25 = vmul.f32 %v2020_v23, %v2002_v60 }
 0x39d   :  { %1940 = vmatmul.mubr.msk.f32.vlgmr.msra.gmra.mrb[16].mxu1 %vm371_vm2, %v1093_v24 }
 0x39e   :  { %v2022_v28 = vpop.eup %2021  ;;  %1935 = vmatmul.mubr.msk.f32.vlgmr.msra.gmra.mrb[16].mxu0 %vm371_vm2, %v1092_v25  ;;  %1948 = vmatpush3.msra.mxu1 %v1629_v35 }
 0x39f   :  { %v2024_v30 = vpop.eup %2023  ;;  %v1095_v37 = vmul.f32 %v2022_v28, %v2008_v1  ;;  %1943 = vmatpush3.msra.mxu0 %v1553_v36  ;;  %1944 = vmatprep.mubr.msk.f32.mxu0 %vm2102_vm1, %v2101_v26 }
 0x3a0   :  { %v1094_v29 = vmul.f32 %v2024_v30, %v2290_v0  ;;  %1949 = vmatprep.mubr.msk.f32.mxu1 %vm2102_vm1, %v2101_v26 }
 0x3a1   :  { %1950 = vmatmul.mubr.msk.f32.vlgmr.msra.gmra.mrb[18].mxu1 %vm371_vm2, %v1095_v37 }
 0x3a2   :  { %1945 = vmatmul.mubr.msk.f32.vlgmr.msra.gmra.mrb[18].mxu0 %vm371_vm2, %v1094_v29 }
 0x460   :  { %v1168_v38 = vpop.f32.mrb[12].mxu0 }
 0x461   :  { %v1916_v39 = vpop.f32.mrb[13].mxu0 }
 0x464   :  { %v1244_v31 = vpop.f32.mrb[12].mxu1 }
 0x465   :  { %v1921_v40 = vpop.f32.mrb[13].mxu1 }
 0x468   :  { %v1396_v27 = vpop.f32.mrb[14].mxu1 }
 0x469   :  { %v1705_v41 = vadd.f32 %v1396_v27, %v1244_v31  ;;  %v1931_v42 = vpop.f32.mrb[15].mxu1 }
 0x46c   :  { %v1320_v32 = vpop.f32.mrb[14].mxu0 }
 0x46d   :  { %v1704_v43 = vadd.f32 %v1320_v32, %v1168_v38  ;;  %v1926_v44 = vpop.f32.mrb[15].mxu0 }
 0x470   :  { %v1548_v45 = vpop.f32.mrb[16].mxu1 }
 0x471   :  { %v1472_v46 = vpop.f32.mrb[16].mxu0  ;;  %v1707_v47 = vadd.f32 %v1705_v41, %v1548_v45  ;;  %v1941_v48 = vpop.f32.mrb[17].mxu1 }
 0x472   :  { %v1706_v49 = vadd.f32 %v1704_v43, %v1472_v46  ;;  %v1936_v26 = vpop.f32.mrb[17].mxu0 }
 0x474   :  { %v1700_v51 = vpop.f32.mrb[18].mxu1 }
 0x475   :  { %v1624_v52 = vpop.f32.mrb[18].mxu0  ;;  %v1709_v53 = vadd.f32 %v1707_v47, %v1700_v51  ;;  %v1951_v54 = vpop.f32.mrb[19].mxu1 }
 0x476   :  { %v1708_v55 = vadd.f32 %v1706_v49, %v1624_v52  ;;  %v1946_v56 = vpop.f32.mrb[19].mxu0 }
 0x477   :  { %v1718_v57 = vadd.f32 %v1771_v50, %v1709_v53 }
 0x478   :  { %v1717_v58 = vadd.f32 %v1771_v50, %v1708_v55 }
 0x479   :  { %1720 = vst.msk [vmem:[#allocation7 + $0x8] sm:$0xff] %vm61_vm0, %v1718_v57 }
 0x47a   :  { %1719 = vst.msk [vmem:[#allocation7] sm:$0xff] %vm61_vm0, %v1717_v58 }
 0x47b   :  { %2080 = shalt.err (!%p2077_p6)
}
 0x47c   :  { %s2081_s17 = scalar_lea.hbm %s2347_s3, 256 }
 0x47d   :  { %p2082_p7 = scmp.ne.s32.totalorder %s2347_s3, %s2081_s17  ;;  %p2085_p8 = scmp.lt.u32.totalorder %s2081_s17, %s2347_s3 }
 0x47f   :  { %p2087_p9 = pnand %p2085_p8, %p2082_p7 }
 0x481   :  { %2090 = shalt.err (!%p2087_p9)
}
 0x482   :  { %1732 = dma.vmem_to_hbm [thread:$0]  %s1727_s14, 256, %s2347_s3, [#allocation4], %s2098_s22, %s2098_s22, %s2099_s23  }
 0x483   :  { %2095 = dma.done.wait [#allocation4], 256  }
 0x484   :  { %2096 = vsyncadd [#allocation4], 4294967040 }
 0x485   :  { %1736 = vsyncpa [#allocation3], 1 }
 0x486   :  { %1737 = vsyncpa [#allocation6], 1 }
 0x487   :  { %1738 = vsyncpa [#allocation4], 1 }

</bundles_post_ra>
